<compile_context>
chip_gen: v7x
topology: tpu7x:2x2x1
jax: 0.10.0
libtpu: 0.0.40
codegen_flags: <defaults>
</compile_context>

<pallas_src>
from functools import partial

import jax
import jax.numpy as jnp
from jax import lax
from jax.experimental import pallas as pl
from jax.experimental.pallas import tpu as pltpu


def _round_up(x, m):
    return ((x + m - 1) // m) * m


def _conv3x3_fused_rows_kernel(x_ref, w_ref, b_ref, o_ref):
    """Single-step fused-M 3x3 VALID conv.

    x_ref: (M_in,  Kp)  bf16  row-flattened input; row m = n*H + h, Kp = pad128(W*Cin)
    w_ref: (3, Kp, Np)  bf16  banded per-dy weight matrices, Np = pad128(Wout*Cout)
    b_ref: (1, Np)      f32   bias tiled across Wout (zeros in pad lanes)
    o_ref: (M_out, Np)  f32   output rows m = n*H + h (rows with h >= H-2 are don't-care)
    """
    m_out = o_ref.shape[0]
    # Initialise the accumulator with the broadcast bias (no separate epilogue add).
    acc = jnp.broadcast_to(b_ref[...], o_ref.shape).astype(jnp.float32)
    # 3 MXU matmuls; the dx taps and the Cin contraction are already fused into the band,
    # so each matmul has K = pad128(W*Cin) and N = pad128(Wout*Cout).
    for dy in range(3):
        acc = acc + jnp.dot(x_ref[dy:dy + m_out, :], w_ref[dy],
                            preferred_element_type=jnp.float32)
    o_ref[...] = acc.astype(o_ref.dtype)


def prepare_unet_block2_params(weight_oihw, bias, image_hw):
    """Build the per-dy banded weight matrices + tiled bias ONCE per weight set.

    band[dy, wi*Cin + ci, wo*Cout + co] = W[co, ci, dy, wi - wo] (zero outside the band),
    zero-padded so that K = W*Cin and Nout = Wout*Cout become multiples of 128.
    """
    h, w = image_hw
    c_out, c_in, kh, kw = weight_oihw.shape
    assert (kh, kw) == (3, 3)
    w_out = w - 2
    k = w * c_in
    n_out = w_out * c_out
    k_p = _round_up(k, 128)
    n_p = _round_up(n_out, 128)

    w_hwio = jnp.transpose(weight_oihw, (2, 3, 1, 0)).astype(jnp.float32)  # (3,3,Cin,Cout)
    band = jnp.stack(
        [sum(jnp.kron(jnp.eye(w, w_out, k=-dx, dtype=jnp.float32), w_hwio[dy, dx])
             for dx in range(3))
         for dy in range(3)],
        axis=0)                                                            # (3, K, Nout)
    band = jnp.pad(band, ((0, 0), (0, k_p - k), (0, n_p - n_out))).astype(jnp.bfloat16)

    bias_row = jnp.pad(jnp.tile(bias.astype(jnp.float32), w_out),
                       (0, n_p - n_out)).reshape(1, n_p)
    return band, bias_row


def _pick_vmem_limit(working_set_bytes):
    """Generation-aware VMEM limit (v7x: 64 MiB physical; v5e/v6e: 128 MiB)."""
    try:
        cap = pltpu.get_tpu_info().vmem_capacity_bytes
    except Exception:
        cap = 64 * 1024 * 1024
    limit = min(cap // 2, max(8 * 1024 * 1024, 2 * working_set_bytes))
    assert working_set_bytes <= limit, (working_set_bytes, limit)
    return limit


@partial(jax.jit, static_argnames=("c_out",))
def unet_block2_forward(x_nchw, band, bias_row, *, c_out):
    """out = conv2d(x, weight, bias), k=3, stride=1, padding=0 (VALID), NCHW in/out."""
    n, c_in, h, w = x_nchw.shape
    h_out, w_out = h - 2, w - 2
    k_p, n_p = band.shape[1], band.shape[2]

    # Fused M dimension: all (batch, image-row) pairs stacked along M.
    m_out_pad = _round_up(n * h, 8)            # output rows computed by the kernel
    m_in_pad = _round_up(m_out_pad + 2, 8)     # input rows (room for the dy=2 shift)

    # NCHW -> NHWC -> lane-dense rows (N*H, W*Cin), zero-padded to (M_in, Kp), bf16 MXU operand.
    x_rows = jnp.transpose(x_nchw, (0, 2, 3, 1)).reshape(n * h, w * c_in).astype(jnp.bfloat16)
    x_flat = jnp.pad(x_rows, ((0, m_in_pad - n * h), (0, k_p - w * c_in)))

    # VMEM working set (default double-buffering on every operand, single grid step).
    working_set = (2 * m_in_pad * k_p * 2          # input rows, bf16
                   + 2 * 3 * k_p * n_p * 2         # banded weights, bf16
                   + 2 * 1 * n_p * 4               # bias row, f32
                   + 2 * m_out_pad * n_p * 4)      # output rows, f32
    vmem_limit = _pick_vmem_limit(working_set)

    out_rows = pl.pallas_call(
        _conv3x3_fused_rows_kernel,
        out_shape=jax.ShapeDtypeStruct((m_out_pad, n_p), jnp.float32),
        grid_spec=pltpu.PrefetchScalarGridSpec(
            num_scalar_prefetch=0,
            grid=(1,),
            in_specs=[
                pl.BlockSpec((m_in_pad, k_p), lambda i: (0, 0)),
                pl.BlockSpec((3, k_p, n_p), lambda i: (0, 0, 0)),
                pl.BlockSpec((1, n_p), lambda i: (0, 0)),
            ],
            out_specs=pl.BlockSpec((m_out_pad, n_p), lambda i: (0, 0)),
        ),
        compiler_params=pltpu.CompilerParams(
            dimension_semantics=("arbitrary",),
            vmem_limit_bytes=vmem_limit,
        ),
    )(x_flat, band, bias_row)

    # Drop pad lanes / pad rows; row m = b*H + i is valid for i < H_out.  Back to NCHW.
    out = out_rows[: n * h, : w_out * c_out].reshape(n, h, w_out, c_out)[:, :h_out]
    return jnp.transpose(out, (0, 3, 1, 2))


def _init_params(key, in_channels, out_channels):
    """Deterministic init matching nn.Conv2d parameter shapes (kaiming-uniform-ish)."""
    k_w, k_b = jax.random.split(key)
    fan_in = in_channels * 3 * 3
    bound = 1.0 / jnp.sqrt(fan_in)
    weight = jax.random.uniform(
        k_w, (out_channels, in_channels, 3, 3), jnp.float32, -bound, bound)
    bias = jax.random.uniform(k_b, (out_channels,), jnp.float32, -bound, bound)
    return weight, bias


if __name__ == "__main__":
    key = jax.random.PRNGKey(0)
    k_x, k_p = jax.random.split(key)

    N, C_IN, C_OUT, H, W = 2, 4, 8, 16, 16
    x = jax.random.normal(k_x, (N, C_IN, H, W), jnp.float32)
    weight, bias = _init_params(k_p, C_IN, C_OUT)

    # Banded weights / bias are built once per weight set (outside the per-call jit).
    band, bias_row = prepare_unet_block2_params(weight, bias, (H, W))

    out = jax.block_until_ready(unet_block2_forward(x, band, bias_row, c_out=C_OUT))
    assert out.shape == (N, C_OUT, H - 2, W - 2), out.shape

    # Reference: identical conv semantics (VALID 3x3 + bias).  Inputs are rounded to bf16
    # exactly like the kernel's MXU operands; accumulation stays f32 (Precision.HIGHEST),
    # so the comparison isolates kernel correctness at tight tolerance.
    x_bf = x.astype(jnp.bfloat16).astype(jnp.float32)
    w_bf = weight.astype(jnp.bfloat16).astype(jnp.float32)
    ref = lax.conv_general_dilated(
        x_bf, w_bf, window_strides=(1, 1), padding="VALID",
        dimension_numbers=("NCHW", "OIHW", "NCHW"),
        precision=lax.Precision.HIGHEST) + bias[None, :, None, None]
    max_err = float(jnp.max(jnp.abs(out - ref)))
    assert jnp.allclose(out, ref, atol=1e-4, rtol=1e-4), f"mismatch vs reference conv: {max_err}"

    print("KERNEL_OK")
</pallas_src>

<mosaic_0001>
module attributes {stable_mosaic.version = 11 : i64} {
  func.func @_conv3x3_fused_rows_kernel(%arg0: i32, %arg1: memref<40x128xbf16, #tpu.memory_space<vmem>>, %arg2: memref<3x128x128xbf16, #tpu.memory_space<vmem>>, %arg3: memref<1x128xf32, #tpu.memory_space<vmem>>, %arg4: memref<32x128xf32, #tpu.memory_space<vmem>>) attributes {dimension_semantics = [#tpu.dimension_semantics<arbitrary>], iteration_bounds = array<i64: 1>, scalar_prefetch = 0 : i64, scratch_operands = 0 : i64, tpu.core_type = #tpu.core_type<tc>, window_params = [{pipeline_mode = #tpu.pipeline_mode<synchronous>, transform_indices = @transform_0, window_bounds = array<i64: 40, 128>}, {pipeline_mode = #tpu.pipeline_mode<synchronous>, transform_indices = @transform_1, window_bounds = array<i64: 3, 128, 128>}, {pipeline_mode = #tpu.pipeline_mode<synchronous>, transform_indices = @transform_2, window_bounds = array<i64: 1, 128>}, {pipeline_mode = #tpu.pipeline_mode<synchronous>, transform_indices = @transform_3, window_bounds = array<i64: 32, 128>}]} {
    %c0 = arith.constant 0 : index
    %c0_0 = arith.constant 0 : index
    %0 = vector.load %arg3[%c0, %c0_0] : memref<1x128xf32, #tpu.memory_space<vmem>>, vector<1x128xf32>
    %1 = vector.shape_cast %0 : vector<1x128xf32> to vector<1x128xf32>
    %2 = vector.broadcast %1 : vector<1x128xf32> to vector<32x128xf32>
    %c0_1 = arith.constant 0 : index
    %c0_2 = arith.constant 0 : index
    %3 = vector.load %arg1[%c0_1, %c0_2] : memref<40x128xbf16, #tpu.memory_space<vmem>>, vector<32x128xbf16>
    %c0_3 = arith.constant 0 : index
    %c0_4 = arith.constant 0 : index
    %c0_5 = arith.constant 0 : index
    %4 = vector.load %arg2[%c0_3, %c0_4, %c0_5] : memref<3x128x128xbf16, #tpu.memory_space<vmem>>, vector<1x128x128xbf16>
    %5 = vector.shape_cast %4 : vector<1x128x128xbf16> to vector<128x128xbf16>
    %cst = arith.constant dense<0.000000e+00> : vector<32x128xf32>
    %6 = tpu.matmul %3, %5, %cst {dimension_numbers = #tpu.dot_dimension_numbers<[1], [0], [0], [1], [0, 0, 1, 1], [], []>} : vector<32x128xbf16>, vector<128x128xbf16>, vector<32x128xf32> -> vector<32x128xf32>
    %7 = arith.addf %2, %6 : vector<32x128xf32>
    %c1 = arith.constant 1 : index
    %c0_6 = arith.constant 0 : index
    %8 = vector.load %arg1[%c1, %c0_6] : memref<40x128xbf16, #tpu.memory_space<vmem>>, vector<32x128xbf16>
    %c1_7 = arith.constant 1 : index
    %c0_8 = arith.constant 0 : index
    %c0_9 = arith.constant 0 : index
    %9 = vector.load %arg2[%c1_7, %c0_8, %c0_9] : memref<3x128x128xbf16, #tpu.memory_space<vmem>>, vector<1x128x128xbf16>
    %10 = vector.shape_cast %9 : vector<1x128x128xbf16> to vector<128x128xbf16>
    %cst_10 = arith.constant dense<0.000000e+00> : vector<32x128xf32>
    %11 = tpu.matmul %8, %10, %cst_10 {dimension_numbers = #tpu.dot_dimension_numbers<[1], [0], [0], [1], [0, 0, 1, 1], [], []>} : vector<32x128xbf16>, vector<128x128xbf16>, vector<32x128xf32> -> vector<32x128xf32>
    %12 = arith.addf %7, %11 : vector<32x128xf32>
    %c2 = arith.constant 2 : index
    %c0_11 = arith.constant 0 : index
    %13 = vector.load %arg1[%c2, %c0_11] : memref<40x128xbf16, #tpu.memory_space<vmem>>, vector<32x128xbf16>
    %c2_12 = arith.constant 2 : index
    %c0_13 = arith.constant 0 : index
    %c0_14 = arith.constant 0 : index
    %14 = vector.load %arg2[%c2_12, %c0_13, %c0_14] : memref<3x128x128xbf16, #tpu.memory_space<vmem>>, vector<1x128x128xbf16>
    %15 = vector.shape_cast %14 : vector<1x128x128xbf16> to vector<128x128xbf16>
    %cst_15 = arith.constant dense<0.000000e+00> : vector<32x128xf32>
    %16 = tpu.matmul %13, %15, %cst_15 {dimension_numbers = #tpu.dot_dimension_numbers<[1], [0], [0], [1], [0, 0, 1, 1], [], []>} : vector<32x128xbf16>, vector<128x128xbf16>, vector<32x128xf32> -> vector<32x128xf32>
    %17 = arith.addf %12, %16 : vector<32x128xf32>
    %c0_16 = arith.constant 0 : index
    %c0_17 = arith.constant 0 : index
    %18 = vector.load %arg4[%c0_16, %c0_17] : memref<32x128xf32, #tpu.memory_space<vmem>>, vector<32x128xf32>
    tpu.vector_store %arg4[%c0_16, %c0_17], %17 {strides = array<i32>} : memref<32x128xf32, #tpu.memory_space<vmem>>, vector<32x128xf32>,
    return
  }
  func.func @transform_0(%arg0: i32) -> (i32, i32) {
    %c0_i32 = arith.constant 0 : i32
    %c0_i32_0 = arith.constant 0 : i32
    %c0_i32_1 = arith.constant 0 : i32
    return %c0_i32, %c0_i32_0 : i32, i32
  }
  func.func @transform_1(%arg0: i32) -> (i32, i32, i32) {
    %c0_i32 = arith.constant 0 : i32
    %c0_i32_0 = arith.constant 0 : i32
    %c0_i32_1 = arith.constant 0 : i32
    %c0_i32_2 = arith.constant 0 : i32
    return %c0_i32, %c0_i32_0, %c0_i32_1 : i32, i32, i32
  }
  func.func @transform_2(%arg0: i32) -> (i32, i32) {
    %c0_i32 = arith.constant 0 : i32
    %c0_i32_0 = arith.constant 0 : i32
    %c0_i32_1 = arith.constant 0 : i32
    return %c0_i32, %c0_i32_0 : i32, i32
  }
  func.func @transform_3(%arg0: i32) -> (i32, i32) {
    %c0_i32 = arith.constant 0 : i32
    %c0_i32_0 = arith.constant 0 : i32
    %c0_i32_1 = arith.constant 0 : i32
    return %c0_i32, %c0_i32_0 : i32, i32
  }
}

</mosaic_0001>

<bundles_post_ra>
// kernel: unet_block2_forward.1
= control target key start
LH: loop header
LB: loop body
LE: loop exit
PB: predicated region body
PF: predicated region fallthrough
CT: control target
= control target key end

     0   :  { %vm190_vm0 = vsmask.f32 7424  ;;  %vm335_vm1 = vcmask 1046528   ;;  %s788_s1 = inlined_call_operand.vmem [shape: bf16[3,128,128], index: 1, kind: input, shape index: {}]   ;;  %s789_s0 = inlined_call_operand.vmem [shape: bf16[40,128], index: 0, kind: input, shape index: {}]   ;;  %s790_s2 = inlined_call_operand.vmem [shape: f32[1,128], index: 2, kind: input, shape index: {}]   ;;  %s791_s3 = inlined_call_operand.vmem [shape: f32[32,128], index: 3, kind: output, shape index: {}]  }
   0x1   :  { %v617_v0 = vld [vmem:[%s788_s1 + $0x40] sm:$0xff]   ;;  %v618_v1 = vld [vmem:[%s788_s1 + $0x48] sm:$0xff]   ;;  %v619_v2 = vld [vmem:[%s788_s1 + $0x50] sm:$0xff]  }
   0x2   :  { %565 = vmatprep.subr.bf16.mxu0 %v617_v0  ;;  %v624_v3 = vld [vmem:[%s788_s1] sm:$0xff]   ;;  %v620_v4 = vld [vmem:[%s788_s1 + $0x58] sm:$0xff]   ;;  %v626_v5 = vld [vmem:[%s788_s1 + $0x8] sm:$0xff]  }
   0x3   :  { %566 = vmatpush3.bf16.msra.mxu0 %v617_v0  ;;  %545 = vmatprep.subr.bf16.mxu1 %v624_v3  ;;  %v155_v6 = vld [vmem:[%s789_s0] sm:$0xf]  ;;  %v156_v7 = vld [vmem:[%s789_s0 + $0x4] sm:$0xf]  ;;  %v694_v9 = vld [vmem:[%s789_s0 + $0x8] sm:$0xff]  }
   0x4   :  { %567 = vmatprep.subr.bf16.mxu0 %v618_v1  ;;  %546 = vmatpush3.bf16.msra.mxu1 %v624_v3  ;;  %v479_v8 = vcombine.low %v155_v6, %v156_v7  ;;  %v621_v10 = vld [vmem:[%s788_s1 + $0x60] sm:$0xff]   ;;  %v199_v13 = vshll.u32 %v694_v9, 16  ;;  %v631_v14 = vld [vmem:[%s788_s1 + $0x10] sm:$0xff]   ;;  %v622_v15 = vld [vmem:[%s788_s1 + $0x68] sm:$0xff]   ;;  %v203_v24 = vshrl.u32 %v694_v9, 16  ;;  %v337_v35 = vrot.slane %v694_v9, 1 }
   0x5   :  { %547 = vmatprep.subr.bf16.mxu1 %v626_v5  ;;  %v709_v19 = vld [vmem:[%s789_s0 + $0x10] ss:$0 sps:$4 sm:$0x11]   ;;  %v633_v20 = vld [vmem:[%s788_s1 + $0x18] sm:$0xff]   ;;  %v635_v22 = vld [vmem:[%s788_s1 + $0x20] sm:$0xff]  }
   0x6   :  { %v192_v11 = vshrl.u32 %v479_v8, 16  ;;  %v194_v12 = vshll.u32 %v479_v8, 16  ;;  %v201_v17 = vrot.slane %v199_v13, 1  ;;  %v623_v23 = vld [vmem:[%s788_s1 + $0x70] sm:$0xff]   ;;  %v207_v25 = vshll.u32 %v709_v19, 16  ;;  %v637_v26 = vld [vmem:[%s788_s1 + $0x28] sm:$0xff]  }
   0x7   :  { %568 = vmatpush3.bf16.msra.mxu0 %v618_v1  ;;  %v625_v27 = vld [vmem:[%s788_s1 + $0x78] sm:$0xff]   ;;  %v639_v28 = vld [vmem:[%s788_s1 + $0x30] sm:$0xff]   ;;  %v643_v31 = vld [vmem:[%s789_s0] sm:$0xff]   ;;  %v339_v48 = vrot.slane %v709_v19, 1 }
   0x8   :  { %569 = vmatprep.subr.bf16.mxu0 %v619_v2  ;;  %548 = vmatpush3.bf16.msra.mxu1 %v626_v5  ;;  %v196_v16 = vrot.slane %v194_v12, 1  ;;  %v205_v29 = vor.u32 %v203_v24, %v201_v17  ;;  %v209_v30 = vrot.slane %v207_v25, 1  ;;  %v629_v32 = vld [vmem:[%s788_s1 + $0x80] sm:$0xff]   ;;  %v641_v37 = vld [vmem:[%s788_s1 + $0x38] sm:$0xff]   ;;  %v632_v38 = vld [vmem:[%s788_s1 + $0x88] sm:$0xff]  }
   0x9   :  { %549 = vmatprep.subr.bf16.mxu1 %v631_v14  ;;  %561 = vmatprep.mubr.bf16.mxu1 %v643_v31  ;;  %v314_v33 = vld [vmem:[%s789_s0] sm:$0xe]  ;;  %v634_v41 = vld [vmem:[%s788_s1 + $0x90] sm:$0xff]   ;;  %v644_v42 = vld [vmem:[%s789_s0 + $0x8] sm:$0xff]   ;;  %v340_v49 = vsel %vm335_vm1, %v337_v35, %v339_v48 }
   0xa   :  { %v197_v18 = vor.u32 %v196_v16, %v192_v11  ;;  %v506_v34 = vcombine.low %v314_v33, %v156_v7  ;;  %v210_v36 = vsel %vm190_vm0, %v205_v29, %v209_v30  ;;  %v636_v43 = vld [vmem:[%s788_s1 + $0x98] sm:$0xff]   ;;  %v638_v44 = vld [vmem:[%s788_s1 + $0xa0] sm:$0xff]   ;;  %v640_v45 = vld [vmem:[%s788_s1 + $0xa8] sm:$0xff]  }
   0xb   :  { %570 = vmatpush3.bf16.msra.mxu0 %v619_v2  ;;  %v642_v46 = vld [vmem:[%s788_s1 + $0xb0] sm:$0xff]   ;;  %v645_v47 = vld [vmem:[%s788_s1 + $0xb8] sm:$0xff]   ;;  %v452_v54 = vld [vmem:[%s790_s2] ss:$0 sm:$0xff] }
   0xc   :  { %571 = vmatprep.subr.bf16.mxu0 %v620_v4  ;;  %550 = vmatpush3.bf16.msra.mxu1 %v631_v14  ;;  %v202_v21 = vsel %vm190_vm0, %v197_v18, %v201_v17  ;;  %v336_v39 = vrot.slane %v506_v34, 1 }
   0xd   :  { %551 = vmatprep.subr.bf16.mxu1 %v633_v20  ;;  %581 = vmatprep.mubr.bf16.mxu0 %v202_v21 }
   0xe   :  { %v338_v40 = vsel %vm335_vm1, %v336_v39, %v337_v35 }
   0xf   :  { %572 = vmatpush3.bf16.msra.mxu0 %v620_v4 }
  0x10   :  { %573 = vmatprep.subr.bf16.mxu0 %v621_v10  ;;  %552 = vmatpush3.bf16.msra.mxu1 %v633_v20 }
  0x11   :  { %553 = vmatprep.subr.bf16.mxu1 %v635_v22 }
  0x13   :  { %574 = vmatpush3.bf16.msra.mxu0 %v621_v10 }
  0x14   :  { %575 = vmatprep.subr.bf16.mxu0 %v622_v15  ;;  %554 = vmatpush3.bf16.msra.mxu1 %v635_v22 }
  0x15   :  { %555 = vmatprep.subr.bf16.mxu1 %v637_v26 }
  0x17   :  { %576 = vmatpush3.bf16.msra.mxu0 %v622_v15 }
  0x18   :  { %577 = vmatprep.subr.bf16.mxu0 %v623_v23  ;;  %556 = vmatpush3.bf16.msra.mxu1 %v637_v26 }
  0x19   :  { %557 = vmatprep.subr.bf16.mxu1 %v639_v28 }
  0x1b   :  { %578 = vmatpush3.bf16.msra.mxu0 %v623_v23 }
  0x1c   :  { %579 = vmatprep.subr.bf16.mxu0 %v625_v27  ;;  %558 = vmatpush3.bf16.msra.mxu1 %v639_v28 }
  0x1d   :  { %559 = vmatprep.subr.bf16.mxu1 %v641_v37 }
  0x1f   :  { %580 = vmatpush3.bf16.msra.mxu0 %v625_v27 }
  0x20   :  { %585 = vmatprep.subr.bf16.mxu0 %v629_v32  ;;  %560 = vmatpush3.bf16.msra.mxu1 %v641_v37 }
  0x22   :  { %582 = vmatmul.mubr.bf16.vlgmr.msra.gmra.mrb[0].mxu0 %v210_v36 }
  0x23   :  { %586 = vmatpush3.bf16.msra.mxu0 %v629_v32  ;;  %601 = vmatprep.mubr.bf16.mxu0 %v338_v40 }
  0x24   :  { %587 = vmatprep.subr.bf16.mxu0 %v632_v38  ;;  %562 = vmatmul.mubr.bf16.vlgmr.msra.gmra.mrb[0].mxu1 %v644_v42 }
  0x27   :  { %588 = vmatpush3.bf16.msra.mxu0 %v632_v38 }
  0x28   :  { %589 = vmatprep.subr.bf16.mxu0 %v634_v41 }
  0x2b   :  { %590 = vmatpush3.bf16.msra.mxu0 %v634_v41 }
  0x2c   :  { %591 = vmatprep.subr.bf16.mxu0 %v636_v43 }
  0x2f   :  { %592 = vmatpush3.bf16.msra.mxu0 %v636_v43 }
  0x30   :  { %593 = vmatprep.subr.bf16.mxu0 %v638_v44 }
  0x33   :  { %594 = vmatpush3.bf16.msra.mxu0 %v638_v44 }
  0x34   :  { %595 = vmatprep.subr.bf16.mxu0 %v640_v45 }
  0x37   :  { %596 = vmatpush3.bf16.msra.mxu0 %v640_v45 }
  0x38   :  { %597 = vmatprep.subr.bf16.mxu0 %v642_v46 }
  0x3b   :  { %598 = vmatpush3.bf16.msra.mxu0 %v642_v46 }
  0x3c   :  { %599 = vmatprep.subr.bf16.mxu0 %v645_v47 }
  0x3f   :  { %600 = vmatpush3.bf16.msra.mxu0 %v645_v47 }
  0x42   :  { %602 = vmatmul.mubr.bf16.vlgmr.msra.gmra.mrb[0].mxu0 %v340_v49 }
  0xf7   :  { %v563_v50 = vpop.f32.mrb[0].mxu1 }
  0xf8   :  { %v136_v51 = vpop.f32.mrb[1].mxu1  ;;  %v153_v55 = vadd.f32 %v563_v50, %v452_v54 }
  0xf9   :  { %v564_v52 = vpop.f32.mrb[2].mxu1  ;;  %v151_v56 = vadd.f32 %v452_v54, %v136_v51 }
  0xfa   :  { %v139_v53 = vpop.f32.mrb[3].mxu1  ;;  %v154_v58 = vadd.f32 %v564_v52, %v452_v54 }
  0xfb   :  { %v152_v61 = vadd.f32 %v452_v54, %v139_v53 }
 0x115   :  { %v603_v57 = vpop.f32.mrb[0].mxu0 }
 0x116   :  { %v606_v59 = vadd.f32 %v603_v57, %v153_v55  ;;  %v425_v60 = vpop.f32.mrb[1].mxu0 }
 0x117   :  { %v608_v62 = vadd.f32 %v425_v60, %v151_v56  ;;  %v604_v63 = vpop.f32.mrb[2].mxu0 }
 0x118   :  { %446 = vst [vmem:[%s791_s3 + $0x10] sm:$0xff] %v606_v59  ;;  %v610_v0 = vadd.f32 %v604_v63, %v154_v58  ;;  %v428_v1 = vpop.f32.mrb[3].mxu0 }
 0x119   :  { %444 = vst [vmem:[%s791_s3] sm:$0xff] %v608_v62  ;;  %v612_v2 = vadd.f32 %v428_v1, %v152_v61 }
 0x11a   :  { %447 = vst [vmem:[%s791_s3 + $0x18] sm:$0xff] %v610_v0 }
 0x11b   :  { %445 = vst [vmem:[%s791_s3 + $0x8] sm:$0xff] %v612_v2 }

</bundles_post_ra>
